<compile_context>
chip_gen: v5e
topology: v5e:2x2
jax: 0.10.0
libtpu: 0.0.40
codegen_flags: <defaults>
</compile_context>

<pallas_src>
import math

import jax
import jax.numpy as jnp
import numpy as np
from jax.experimental import pallas as pl
from jax.experimental.pallas import tpu as pltpu

NEG_SLOPE = 0.2
LOG_2PI = math.log(2.0 * math.pi)


# ------------------------------- kernel -------------------------------------

def fused_flow_kernel(x_ref, w1_ref, b1_ref, w2_ref, b2_ref, w3_ref, b3_ref,
                      sel1_ref, mid_ref, ptr_ref,
                      zs_ref, ld_ref, lp_ref,
                      x_scr, ld_scr):
    """Runs one coupling layer per (batch-tile, k) grid step.

    Activation and log_det stay resident in VMEM scratch across the K axis.
    At k == K-1 the prior log-prob and the accumulated log-det are written out.
    """
    k = pl.program_id(1)
    num_layers = pl.num_programs(1)

    @pl.when(k == 0)
    def _init():
        x_scr[...] = x_ref[...]
        ld_scr[...] = jnp.zeros_like(ld_scr)

    x = x_scr[...]                      # (bm, d) running activation
    w1 = w1_ref[0]                      # (d, 2nh)  even/odd selection folded in
    b1 = b1_ref[0]                      # (1, 2nh)
    w2 = w2_ref[0]                      # (2nh, 2nh) block-diag(s_w2, t_w2)
    b2 = b2_ref[0]
    w3 = w3_ref[0]                      # (2nh, 2dh) block-diag(s_w3, t_w3)
    b3 = b3_ref[0]
    sel1 = sel1_ref[0]                  # (d, dh)  selects the transformed half
    mid = mid_ref[0]                    # (d, d)   places identity half into z
    ptr = ptr_ref[0]                    # (dh, d)  places transformed half into z
    dh = sel1.shape[1]

    # fused s/t conditioner MLP (LeakyReLU 0.2)
    h = jnp.dot(x, w1, preferred_element_type=jnp.float32) + b1
    h = jnp.where(h > 0, h, NEG_SLOPE * h)
    h = jnp.dot(h, w2, preferred_element_type=jnp.float32) + b2
    h = jnp.where(h > 0, h, NEG_SLOPE * h)
    st = jnp.dot(h, w3, preferred_element_type=jnp.float32) + b3   # (bm, 2dh)
    s = st[:, :dh]
    t = st[:, dh:]

    # affine coupling: z1 = exp(s) * x1 + t ; z = [identity half | z1] placed
    x1 = jnp.dot(x, sel1, preferred_element_type=jnp.float32)      # (bm, dh)
    z1 = jnp.exp(s) * x1 + t
    z = (jnp.dot(x, mid, preferred_element_type=jnp.float32)
         + jnp.dot(z1, ptr, preferred_element_type=jnp.float32))   # (bm, d)

    x_scr[...] = z
    ld_scr[...] = ld_scr[...] + jnp.sum(s, axis=1, keepdims=True)
    zs_ref[0] = z

    @pl.when(k == num_layers - 1)
    def _finalize():
        d = z.shape[1]
        ld_ref[...] = ld_scr[...]
        lp_ref[...] = (-0.5 * jnp.sum(z * z, axis=1, keepdims=True)
                       - 0.5 * d * LOG_2PI)


# -------------------------- parameter fusion / stacking ---------------------

def prepare_fused_params(flow_params, d):
    """Fold parity / even-odd selection / concat placement into per-layer
    constant matrices, fuse s_cond & t_cond weights, stack along K."""
    dh = d // 2
    nh = flow_params[0]["s_w1"].shape[1]
    idx = np.arange(dh)
    sel_even = np.zeros((d, dh), np.float32); sel_even[2 * idx, idx] = 1.0
    sel_odd = np.zeros((d, dh), np.float32); sel_odd[2 * idx + 1, idx] = 1.0
    place_lo = np.zeros((dh, d), np.float32); place_lo[idx, idx] = 1.0
    place_hi = np.zeros((dh, d), np.float32); place_hi[idx, dh + idx] = 1.0

    W1s, B1s, W2s, B2s, W3s, B3s, SEL1s, MIDs, PTRs = ([] for _ in range(9))
    zero_nh = jnp.zeros((nh, nh), jnp.float32)
    zero_nd = jnp.zeros((nh, dh), jnp.float32)

    for k, p in enumerate(flow_params):
        parity = k % 2
        sel0 = sel_odd if parity else sel_even      # conditioning half
        sel1 = sel_even if parity else sel_odd      # transformed half
        p_id = place_hi if parity else place_lo     # where the identity half lands
        p_tr = place_lo if parity else place_hi     # where the transformed half lands

        w1_cat = jnp.concatenate([p["s_w1"], p["t_w1"]], axis=1)      # (dh, 2nh)
        W1s.append(jnp.asarray(sel0) @ w1_cat)                        # (d, 2nh)
        B1s.append(jnp.concatenate([p["s_b1"], p["t_b1"]], axis=1))

        W2s.append(jnp.block([[p["s_w2"], zero_nh], [zero_nh, p["t_w2"]]]))
        B2s.append(jnp.concatenate([p["s_b2"], p["t_b2"]], axis=1))

        W3s.append(jnp.block([[p["s_w3"], zero_nd], [zero_nd, p["t_w3"]]]))
        B3s.append(jnp.concatenate([p["s_b3"], p["t_b3"]], axis=1))

        SEL1s.append(jnp.asarray(sel1))
        MIDs.append(jnp.asarray(sel0 @ p_id))
        PTRs.append(jnp.asarray(p_tr))

    stack = lambda xs: jnp.stack(xs, axis=0)
    return dict(W1=stack(W1s), B1=stack(B1s), W2=stack(W2s), B2=stack(B2s),
                W3=stack(W3s), B3=stack(B3s), SEL1=stack(SEL1s),
                MID=stack(MIDs), PTR=stack(PTRs), nh=nh, dh=dh)


# ------------------------------- wrapper -------------------------------------

def _round_up(a, b):
    return ((a + b - 1) // b) * b


def normalizing_flow_model_forward(x, flow_params, bm=None):
    """NormalizingFlowModel.forward: returns (zs, prior_logprob, log_det)."""
    m, d = x.shape
    K = len(flow_params)
    dh = d // 2
    fp = prepare_fused_params(flow_params, d)
    nh = fp["nh"]

    # batch tiling: multiple of 8 sublanes, modest cap; pad the tail.
    if bm is None:
        bm = min(512, _round_up(m, 8))
    bm = _round_up(min(bm, _round_up(m, 8)), 8)
    m_pad = _round_up(m, bm)
    x_p = jnp.pad(x, ((0, m_pad - m), (0, 0))) if m_pad > m else x

    grid = (m_pad // bm, K)
    row_full = pl.BlockSpec((bm, d), lambda i, k: (i, 0))
    row_one = pl.BlockSpec((bm, 1), lambda i, k: (i, 0))
    layer = lambda shp: pl.BlockSpec((1,) + shp, lambda i, k: (k, 0, 0))

    zs_stacked, log_det, prior_lp = pl.pallas_call(
        fused_flow_kernel,
        grid=grid,
        in_specs=[
            row_full,                    # x
            layer((d, 2 * nh)),          # W1 (selection folded)
            layer((1, 2 * nh)),          # B1
            layer((2 * nh, 2 * nh)),     # W2 block-diag
            layer((1, 2 * nh)),          # B2
            layer((2 * nh, 2 * dh)),     # W3 block-diag
            layer((1, 2 * dh)),          # B3
            layer((d, dh)),              # SEL1
            layer((d, d)),               # MID
            layer((dh, d)),              # PTR
        ],
        out_specs=[
            pl.BlockSpec((1, bm, d), lambda i, k: (k, i, 0)),   # zs[k]
            row_one,                                            # log_det
            row_one,                                            # prior log-prob
        ],
        out_shape=[
            jax.ShapeDtypeStruct((K, m_pad, d), jnp.float32),
            jax.ShapeDtypeStruct((m_pad, 1), jnp.float32),
            jax.ShapeDtypeStruct((m_pad, 1), jnp.float32),
        ],
        scratch_shapes=[pltpu.VMEM((bm, d), jnp.float32),
                        pltpu.VMEM((bm, 1), jnp.float32)],
        compiler_params=pltpu.CompilerParams(
            dimension_semantics=("parallel", "arbitrary")),
    )(x_p, fp["W1"], fp["B1"], fp["W2"], fp["B2"], fp["W3"], fp["B3"],
      fp["SEL1"], fp["MID"], fp["PTR"])

    zs = [x] + [zs_stacked[k, :m, :] for k in range(K)]
    return zs, prior_lp[:m, 0], log_det[:m, 0]


# ----------------------- deterministic parameter init -----------------------

def _linear_init(key, fan_in, fan_out):
    """Matches nn.Linear default: U(-1/sqrt(fan_in), 1/sqrt(fan_in))."""
    kw, kb = jax.random.split(key)
    bound = 1.0 / math.sqrt(fan_in)
    w = jax.random.uniform(kw, (fan_in, fan_out), jnp.float32, -bound, bound)
    b = jax.random.uniform(kb, (1, fan_out), jnp.float32, -bound, bound)
    return w, b


def make_flow_params(key, num_flows, dim, nh):
    dh = dim // 2
    params = []
    for k in range(num_flows):
        kk = jax.random.fold_in(key, k)
        keys = jax.random.split(kk, 6)
        sw1, sb1 = _linear_init(keys[0], dh, nh)
        sw2, sb2 = _linear_init(keys[1], nh, nh)
        sw3, sb3 = _linear_init(keys[2], nh, dh)
        tw1, tb1 = _linear_init(keys[3], dh, nh)
        tw2, tb2 = _linear_init(keys[4], nh, nh)
        tw3, tb3 = _linear_init(keys[5], nh, dh)
        params.append(dict(s_w1=sw1, s_b1=sb1, s_w2=sw2, s_b2=sb2, s_w3=sw3, s_b3=sb3,
                           t_w1=tw1, t_b1=tb1, t_w2=tw2, t_b2=tb2, t_w3=tw3, t_b3=tb3))
    return params


# ------------------------- pure-JAX reference (check) ------------------------

def _ref_forward(x, flow_params):
    def mlp(h, p, pre):
        def lrelu(v):
            return jnp.where(v > 0, v, NEG_SLOPE * v)
        h = lrelu(h @ p[pre + "_w1"] + p[pre + "_b1"])
        h = lrelu(h @ p[pre + "_w2"] + p[pre + "_b2"])
        return h @ p[pre + "_w3"] + p[pre + "_b3"]

    m, d = x.shape
    log_det = jnp.zeros((m,), jnp.float32)
    zs = [x]
    for k, p in enumerate(flow_params):
        x0, x1 = x[:, 0::2], x[:, 1::2]
        if k % 2:
            x0, x1 = x1, x0
        s = mlp(x0, p, "s")
        t = mlp(x0, p, "t")
        z0, z1 = x0, jnp.exp(s) * x1 + t
        if k % 2:
            z0, z1 = z1, z0
        x = jnp.concatenate([z0, z1], axis=1)
        log_det = log_det + jnp.sum(s, axis=1)
        zs.append(x)
    prior_lp = -0.5 * jnp.sum(zs[-1] ** 2, axis=1) - 0.5 * d * LOG_2PI
    return zs, prior_lp, log_det


# ---------------------------------- main -------------------------------------

if __name__ == "__main__":
    key = jax.random.PRNGKey(0)
    m, dim, nh, num_flows = 8, 16, 32, 4

    k_x, k_p = jax.random.split(key)
    x = jax.random.normal(k_x, (m, dim), jnp.float32)
    flow_params = make_flow_params(k_p, num_flows, dim, nh)

    zs, prior_lp, log_det = normalizing_flow_model_forward(x, flow_params)
    jax.block_until_ready((zs, prior_lp, log_det))

    # correctness check against pure-JAX reference
    zs_r, lp_r, ld_r = _ref_forward(x, flow_params)
    for a, b in zip(zs, zs_r):
        np.testing.assert_allclose(np.asarray(a), np.asarray(b), rtol=1e-4, atol=1e-5)
    np.testing.assert_allclose(np.asarray(prior_lp), np.asarray(lp_r), rtol=1e-4, atol=1e-5)
    np.testing.assert_allclose(np.asarray(log_det), np.asarray(ld_r), rtol=1e-4, atol=1e-5)

    print("KERNEL_OK")
</pallas_src>

<mosaic_0001>
module attributes {stable_mosaic.version = 11 : i64} {
  func.func @fused_flow_kernel(%arg0: i32, %arg1: i32, %arg2: memref<8x16xf32, #tpu.memory_space<vmem>>, %arg3: memref<1x16x64xf32, #tpu.memory_space<vmem>>, %arg4: memref<1x1x64xf32, #tpu.memory_space<vmem>>, %arg5: memref<1x64x64xf32, #tpu.memory_space<vmem>>, %arg6: memref<1x1x64xf32, #tpu.memory_space<vmem>>, %arg7: memref<1x64x16xf32, #tpu.memory_space<vmem>>, %arg8: memref<1x1x16xf32, #tpu.memory_space<vmem>>, %arg9: memref<1x16x8xf32, #tpu.memory_space<vmem>>, %arg10: memref<1x16x16xf32, #tpu.memory_space<vmem>>, %arg11: memref<1x8x16xf32, #tpu.memory_space<vmem>>, %arg12: memref<1x8x16xf32, #tpu.memory_space<vmem>>, %arg13: memref<8x1xf32, #tpu.memory_space<vmem>>, %arg14: memref<8x1xf32, #tpu.memory_space<vmem>>, %arg15: memref<8x16xf32, #tpu.memory_space<vmem>>, %arg16: memref<8x1xf32, #tpu.memory_space<vmem>>) attributes {dimension_semantics = [#tpu.dimension_semantics<parallel>, #tpu.dimension_semantics<arbitrary>], iteration_bounds = array<i64: 1, 4>, scalar_prefetch = 0 : i64, scratch_operands = 2 : i64, tpu.core_type = #tpu.core_type<tc>, window_params = [{transform_indices = @transform_0, window_bounds = array<i64: 8, 16>}, {transform_indices = @transform_1, window_bounds = array<i64: 1, 16, 64>}, {transform_indices = @transform_2, window_bounds = array<i64: 1, 1, 64>}, {transform_indices = @transform_3, window_bounds = array<i64: 1, 64, 64>}, {transform_indices = @transform_4, window_bounds = array<i64: 1, 1, 64>}, {transform_indices = @transform_5, window_bounds = array<i64: 1, 64, 16>}, {transform_indices = @transform_6, window_bounds = array<i64: 1, 1, 16>}, {transform_indices = @transform_7, window_bounds = array<i64: 1, 16, 8>}, {transform_indices = @transform_8, window_bounds = array<i64: 1, 16, 16>}, {transform_indices = @transform_9, window_bounds = array<i64: 1, 8, 16>}, {transform_indices = @transform_10, window_bounds = array<i64: 1, 8, 16>}, {transform_indices = @transform_11, window_bounds = array<i64: 8, 1>}, {transform_indices = @transform_12, window_bounds = array<i64: 8, 1>}]} {
    %c0_i32 = arith.constant 0 : i32
    %0 = arith.cmpi eq, %arg1, %c0_i32 : i32
    %1 = arith.extui %0 : i1 to i32
    %c0_i32_0 = arith.constant 0 : i32
    %2 = arith.cmpi ne, %1, %c0_i32_0 : i32
    scf.if %2 {
      %c0_49 = arith.constant 0 : index
      %c0_50 = arith.constant 0 : index
      %62 = vector.load %arg2[%c0_49, %c0_50] : memref<8x16xf32, #tpu.memory_space<vmem>>, vector<8x16xf32>
      %c0_51 = arith.constant 0 : index
      %c0_52 = arith.constant 0 : index
      %63 = vector.load %arg15[%c0_51, %c0_52] : memref<8x16xf32, #tpu.memory_space<vmem>>, vector<8x16xf32>
      tpu.vector_store %arg15[%c0_51, %c0_52], %62 {strides = array<i32>} : memref<8x16xf32, #tpu.memory_space<vmem>>, vector<8x16xf32>,
      %cst_53 = arith.constant 0.000000e+00 : f32
      %64 = vector.broadcast %cst_53 : f32 to vector<8x1xf32>
      %c0_54 = arith.constant 0 : index
      %c0_55 = arith.constant 0 : index
      %65 = vector.load %arg16[%c0_54, %c0_55] : memref<8x1xf32, #tpu.memory_space<vmem>>, vector<8x1xf32>
      tpu.vector_store %arg16[%c0_54, %c0_55], %64 {strides = array<i32>} : memref<8x1xf32, #tpu.memory_space<vmem>>, vector<8x1xf32>,
    } else {
    }
    %c0 = arith.constant 0 : index
    %c0_1 = arith.constant 0 : index
    %3 = vector.load %arg15[%c0, %c0_1] : memref<8x16xf32, #tpu.memory_space<vmem>>, vector<8x16xf32>
    %c0_2 = arith.constant 0 : index
    %c0_3 = arith.constant 0 : index
    %c0_4 = arith.constant 0 : index
    %4 = vector.load %arg3[%c0_2, %c0_3, %c0_4] : memref<1x16x64xf32, #tpu.memory_space<vmem>>, vector<1x16x64xf32>
    %5 = vector.shape_cast %4 : vector<1x16x64xf32> to vector<16x64xf32>
    %c0_5 = arith.constant 0 : index
    %c0_6 = arith.constant 0 : index
    %c0_7 = arith.constant 0 : index
    %6 = vector.load %arg4[%c0_5, %c0_6, %c0_7] : memref<1x1x64xf32, #tpu.memory_space<vmem>>, vector<1x1x64xf32>
    %7 = vector.shape_cast %6 : vector<1x1x64xf32> to vector<1x64xf32>
    %c0_8 = arith.constant 0 : index
    %c0_9 = arith.constant 0 : index
    %c0_10 = arith.constant 0 : index
    %8 = vector.load %arg5[%c0_8, %c0_9, %c0_10] : memref<1x64x64xf32, #tpu.memory_space<vmem>>, vector<1x64x64xf32>
    %9 = vector.shape_cast %8 : vector<1x64x64xf32> to vector<64x64xf32>
    %c0_11 = arith.constant 0 : index
    %c0_12 = arith.constant 0 : index
    %c0_13 = arith.constant 0 : index
    %10 = vector.load %arg6[%c0_11, %c0_12, %c0_13] : memref<1x1x64xf32, #tpu.memory_space<vmem>>, vector<1x1x64xf32>
    %11 = vector.shape_cast %10 : vector<1x1x64xf32> to vector<1x64xf32>
    %c0_14 = arith.constant 0 : index
    %c0_15 = arith.constant 0 : index
    %c0_16 = arith.constant 0 : index
    %12 = vector.load %arg7[%c0_14, %c0_15, %c0_16] : memref<1x64x16xf32, #tpu.memory_space<vmem>>, vector<1x64x16xf32>
    %13 = vector.shape_cast %12 : vector<1x64x16xf32> to vector<64x16xf32>
    %c0_17 = arith.constant 0 : index
    %c0_18 = arith.constant 0 : index
    %c0_19 = arith.constant 0 : index
    %14 = vector.load %arg8[%c0_17, %c0_18, %c0_19] : memref<1x1x16xf32, #tpu.memory_space<vmem>>, vector<1x1x16xf32>
    %15 = vector.shape_cast %14 : vector<1x1x16xf32> to vector<1x16xf32>
    %c0_20 = arith.constant 0 : index
    %c0_21 = arith.constant 0 : index
    %c0_22 = arith.constant 0 : index
    %16 = vector.load %arg9[%c0_20, %c0_21, %c0_22] : memref<1x16x8xf32, #tpu.memory_space<vmem>>, vector<1x16x8xf32>
    %17 = vector.shape_cast %16 : vector<1x16x8xf32> to vector<16x8xf32>
    %c0_23 = arith.constant 0 : index
    %c0_24 = arith.constant 0 : index
    %c0_25 = arith.constant 0 : index
    %18 = vector.load %arg10[%c0_23, %c0_24, %c0_25] : memref<1x16x16xf32, #tpu.memory_space<vmem>>, vector<1x16x16xf32>
    %19 = vector.shape_cast %18 : vector<1x16x16xf32> to vector<16x16xf32>
    %c0_26 = arith.constant 0 : index
    %c0_27 = arith.constant 0 : index
    %c0_28 = arith.constant 0 : index
    %20 = vector.load %arg11[%c0_26, %c0_27, %c0_28] : memref<1x8x16xf32, #tpu.memory_space<vmem>>, vector<1x8x16xf32>
    %21 = vector.shape_cast %20 : vector<1x8x16xf32> to vector<8x16xf32>
    %cst = arith.constant dense<0.000000e+00> : vector<8x64xf32>
    %22 = tpu.matmul %3, %5, %cst {dimension_numbers = #tpu.dot_dimension_numbers<[1], [0], [0], [1], [0, 0, 1, 1], [], []>} : vector<8x16xf32>, vector<16x64xf32>, vector<8x64xf32> -> vector<8x64xf32>
    %23 = vector.broadcast %7 : vector<1x64xf32> to vector<8x64xf32>
    %24 = arith.addf %22, %23 : vector<8x64xf32>
    %cst_29 = arith.constant 0.000000e+00 : f32
    %25 = vector.broadcast %cst_29 : f32 to vector<8x64xf32>
    %26 = arith.cmpf ogt, %24, %25 : vector<8x64xf32>
    %cst_30 = arith.constant 2.000000e-01 : f32
    %27 = vector.broadcast %cst_30 : f32 to vector<8x64xf32>
    %28 = arith.mulf %27, %24 : vector<8x64xf32>
    %29 = arith.select %26, %24, %28 : vector<8x64xi1>, vector<8x64xf32>
    %cst_31 = arith.constant dense<0.000000e+00> : vector<8x64xf32>
    %30 = tpu.matmul %29, %9, %cst_31 {dimension_numbers = #tpu.dot_dimension_numbers<[1], [0], [0], [1], [0, 0, 1, 1], [], []>} : vector<8x64xf32>, vector<64x64xf32>, vector<8x64xf32> -> vector<8x64xf32>
    %31 = vector.broadcast %11 : vector<1x64xf32> to vector<8x64xf32>
    %32 = arith.addf %30, %31 : vector<8x64xf32>
    %cst_32 = arith.constant 0.000000e+00 : f32
    %33 = vector.broadcast %cst_32 : f32 to vector<8x64xf32>
    %34 = arith.cmpf ogt, %32, %33 : vector<8x64xf32>
    %cst_33 = arith.constant 2.000000e-01 : f32
    %35 = vector.broadcast %cst_33 : f32 to vector<8x64xf32>
    %36 = arith.mulf %35, %32 : vector<8x64xf32>
    %37 = arith.select %34, %32, %36 : vector<8x64xi1>, vector<8x64xf32>
    %cst_34 = arith.constant dense<0.000000e+00> : vector<8x16xf32>
    %38 = tpu.matmul %37, %13, %cst_34 {dimension_numbers = #tpu.dot_dimension_numbers<[1], [0], [0], [1], [0, 0, 1, 1], [], []>} : vector<8x64xf32>, vector<64x16xf32>, vector<8x16xf32> -> vector<8x16xf32>
    %39 = vector.broadcast %15 : vector<1x16xf32> to vector<8x16xf32>
    %40 = arith.addf %38, %39 : vector<8x16xf32>
    %41 = vector.extract_strided_slice %40 {offsets = [0, 0], sizes = [8, 8], strides = [1, 1]} : vector<8x16xf32> to vector<8x8xf32>
    %42 = vector.extract_strided_slice %40 {offsets = [0, 8], sizes = [8, 8], strides = [1, 1]} : vector<8x16xf32> to vector<8x8xf32>
    %cst_35 = arith.constant dense<0.000000e+00> : vector<8x8xf32>
    %43 = tpu.matmul %3, %17, %cst_35 {dimension_numbers = #tpu.dot_dimension_numbers<[1], [0], [0], [1], [0, 0, 1, 1], [], []>} : vector<8x16xf32>, vector<16x8xf32>, vector<8x8xf32> -> vector<8x8xf32>
    %44 = math.exp %41 : vector<8x8xf32>
    %45 = arith.mulf %44, %43 : vector<8x8xf32>
    %46 = arith.addf %45, %42 : vector<8x8xf32>
    %cst_36 = arith.constant dense<0.000000e+00> : vector<8x16xf32>
    %47 = tpu.matmul %3, %19, %cst_36 {dimension_numbers = #tpu.dot_dimension_numbers<[1], [0], [0], [1], [0, 0, 1, 1], [], []>} : vector<8x16xf32>, vector<16x16xf32>, vector<8x16xf32> -> vector<8x16xf32>
    %cst_37 = arith.constant dense<0.000000e+00> : vector<8x16xf32>
    %48 = tpu.matmul %46, %21, %cst_37 {dimension_numbers = #tpu.dot_dimension_numbers<[1], [0], [0], [1], [0, 0, 1, 1], [], []>} : vector<8x8xf32>, vector<8x16xf32>, vector<8x16xf32> -> vector<8x16xf32>
    %49 = arith.addf %47, %48 : vector<8x16xf32>
    %c0_38 = arith.constant 0 : index
    %c0_39 = arith.constant 0 : index
    %50 = vector.load %arg15[%c0_38, %c0_39] : memref<8x16xf32, #tpu.memory_space<vmem>>, vector<8x16xf32>
    tpu.vector_store %arg15[%c0_38, %c0_39], %49 {strides = array<i32>} : memref<8x16xf32, #tpu.memory_space<vmem>>, vector<8x16xf32>,
    %c0_40 = arith.constant 0 : index
    %c0_41 = arith.constant 0 : index
    %51 = vector.load %arg16[%c0_40, %c0_41] : memref<8x1xf32, #tpu.memory_space<vmem>>, vector<8x1xf32>
    %cst_42 = arith.constant dense<0.000000e+00> : vector<8xf32>
    %52 = vector.multi_reduction <add>, %41, %cst_42 [1] : vector<8x8xf32> to vector<8xf32>
    %53 = vector.shape_cast %52 : vector<8xf32> to vector<8x1xf32>
    %54 = arith.addf %51, %53 : vector<8x1xf32>
    %c0_43 = arith.constant 0 : index
    %c0_44 = arith.constant 0 : index
    %55 = vector.load %arg16[%c0_43, %c0_44] : memref<8x1xf32, #tpu.memory_space<vmem>>, vector<8x1xf32>
    tpu.vector_store %arg16[%c0_43, %c0_44], %54 {strides = array<i32>} : memref<8x1xf32, #tpu.memory_space<vmem>>, vector<8x1xf32>,
    %c0_45 = arith.constant 0 : index
    %c0_46 = arith.constant 0 : index
    %c0_47 = arith.constant 0 : index
    %56 = vector.load %arg12[%c0_45, %c0_46, %c0_47] : memref<1x8x16xf32, #tpu.memory_space<vmem>>, vector<1x8x16xf32>
    %57 = vector.shape_cast %56 : vector<1x8x16xf32> to vector<8x16xf32>
    %58 = vector.shape_cast %49 : vector<8x16xf32> to vector<1x8x16xf32>
    tpu.vector_store %arg12[%c0_45, %c0_46, %c0_47], %58 {strides = array<i32>} : memref<1x8x16xf32, #tpu.memory_space<vmem>>, vector<1x8x16xf32>,
    %c3_i32 = arith.constant 3 : i32
    %59 = arith.cmpi eq, %arg1, %c3_i32 : i32
    %60 = arith.extui %59 : i1 to i32
    %c0_i32_48 = arith.constant 0 : i32
    %61 = arith.cmpi ne, %60, %c0_i32_48 : i32
    scf.if %61 {
      %c0_49 = arith.constant 0 : index
      %c0_50 = arith.constant 0 : index
      %62 = vector.load %arg16[%c0_49, %c0_50] : memref<8x1xf32, #tpu.memory_space<vmem>>, vector<8x1xf32>
      %c0_51 = arith.constant 0 : index
      %c0_52 = arith.constant 0 : index
      %63 = vector.load %arg13[%c0_51, %c0_52] : memref<8x1xf32, #tpu.memory_space<vmem>>, vector<8x1xf32>
      tpu.vector_store %arg13[%c0_51, %c0_52], %62 {strides = array<i32>} : memref<8x1xf32, #tpu.memory_space<vmem>>, vector<8x1xf32>,
      %64 = arith.mulf %49, %49 : vector<8x16xf32>
      %cst_53 = arith.constant dense<0.000000e+00> : vector<8xf32>
      %65 = vector.multi_reduction <add>, %64, %cst_53 [1] : vector<8x16xf32> to vector<8xf32>
      %66 = vector.shape_cast %65 : vector<8xf32> to vector<8x1xf32>
      %cst_54 = arith.constant -5.000000e-01 : f32
      %67 = vector.broadcast %cst_54 : f32 to vector<8x1xf32>
      %68 = arith.mulf %67, %66 : vector<8x1xf32>
      %cst_55 = arith.constant 14.7030163 : f32
      %69 = vector.broadcast %cst_55 : f32 to vector<8x1xf32>
      %70 = arith.subf %68, %69 : vector<8x1xf32>
      %c0_56 = arith.constant 0 : index
      %c0_57 = arith.constant 0 : index
      %71 = vector.load %arg14[%c0_56, %c0_57] : memref<8x1xf32, #tpu.memory_space<vmem>>, vector<8x1xf32>
      tpu.vector_store %arg14[%c0_56, %c0_57], %70 {strides = array<i32>} : memref<8x1xf32, #tpu.memory_space<vmem>>, vector<8x1xf32>,
    } else {
    }
    return
  }
  func.func @transform_0(%arg0: i32, %arg1: i32) -> (i32, i32) {
    %c0_i32 = arith.constant 0 : i32
    %c0_i32_0 = arith.constant 0 : i32
    return %arg0, %c0_i32 : i32, i32
  }
  func.func @transform_1(%arg0: i32, %arg1: i32) -> (i32, i32, i32) {
    %c0_i32 = arith.constant 0 : i32
    %c0_i32_0 = arith.constant 0 : i32
    %c0_i32_1 = arith.constant 0 : i32
    return %arg1, %c0_i32, %c0_i32_0 : i32, i32, i32
  }
  func.func @transform_2(%arg0: i32, %arg1: i32) -> (i32, i32, i32) {
    %c0_i32 = arith.constant 0 : i32
    %c0_i32_0 = arith.constant 0 : i32
    %c0_i32_1 = arith.constant 0 : i32
    return %arg1, %c0_i32, %c0_i32_0 : i32, i32, i32
  }
  func.func @transform_3(%arg0: i32, %arg1: i32) -> (i32, i32, i32) {
    %c0_i32 = arith.constant 0 : i32
    %c0_i32_0 = arith.constant 0 : i32
    %c0_i32_1 = arith.constant 0 : i32
    return %arg1, %c0_i32, %c0_i32_0 : i32, i32, i32
  }
  func.func @transform_4(%arg0: i32, %arg1: i32) -> (i32, i32, i32) {
    %c0_i32 = arith.constant 0 : i32
    %c0_i32_0 = arith.constant 0 : i32
    %c0_i32_1 = arith.constant 0 : i32
    return %arg1, %c0_i32, %c0_i32_0 : i32, i32, i32
  }
  func.func @transform_5(%arg0: i32, %arg1: i32) -> (i32, i32, i32) {
    %c0_i32 = arith.constant 0 : i32
    %c0_i32_0 = arith.constant 0 : i32
    %c0_i32_1 = arith.constant 0 : i32
    return %arg1, %c0_i32, %c0_i32_0 : i32, i32, i32
  }
  func.func @transform_6(%arg0: i32, %arg1: i32) -> (i32, i32, i32) {
    %c0_i32 = arith.constant 0 : i32
    %c0_i32_0 = arith.constant 0 : i32
    %c0_i32_1 = arith.constant 0 : i32
    return %arg1, %c0_i32, %c0_i32_0 : i32, i32, i32
  }
  func.func @transform_7(%arg0: i32, %arg1: i32) -> (i32, i32, i32) {
    %c0_i32 = arith.constant 0 : i32
    %c0_i32_0 = arith.constant 0 : i32
    %c0_i32_1 = arith.constant 0 : i32
    return %arg1, %c0_i32, %c0_i32_0 : i32, i32, i32
  }
  func.func @transform_8(%arg0: i32, %arg1: i32) -> (i32, i32, i32) {
    %c0_i32 = arith.constant 0 : i32
    %c0_i32_0 = arith.constant 0 : i32
    %c0_i32_1 = arith.constant 0 : i32
    return %arg1, %c0_i32, %c0_i32_0 : i32, i32, i32
  }
  func.func @transform_9(%arg0: i32, %arg1: i32) -> (i32, i32, i32) {
    %c0_i32 = arith.constant 0 : i32
    %c0_i32_0 = arith.constant 0 : i32
    %c0_i32_1 = arith.constant 0 : i32
    return %arg1, %c0_i32, %c0_i32_0 : i32, i32, i32
  }
  func.func @transform_10(%arg0: i32, %arg1: i32) -> (i32, i32, i32) {
    %c0_i32 = arith.constant 0 : i32
    %c0_i32_0 = arith.constant 0 : i32
    return %arg1, %arg0, %c0_i32 : i32, i32, i32
  }
  func.func @transform_11(%arg0: i32, %arg1: i32) -> (i32, i32) {
    %c0_i32 = arith.constant 0 : i32
    %c0_i32_0 = arith.constant 0 : i32
    return %arg0, %c0_i32 : i32, i32
  }
  func.func @transform_12(%arg0: i32, %arg1: i32) -> (i32, i32) {
    %c0_i32 = arith.constant 0 : i32
    %c0_i32_0 = arith.constant 0 : i32
    return %arg0, %c0_i32 : i32, i32
  }
}

</mosaic_0001>

<bundles_post_ra>
// kernel: tpu_custom_call.1
= control target key start
LH: loop header
LB: loop body
LE: loop exit
PB: predicated region body
PF: predicated region fallthrough
CT: control target
= control target key end

     0   :  { %s1848_s0 = inlined_call_operand.hbm [shape: f32[8,16], index: 0, kind: input, shape index: {}]   ;;  %s1849_s1 = inlined_call_operand.vmem [shape: f32[4,16,64], index: 1, kind: input, shape index: {}]   ;;  %s1850_s2 = inlined_call_operand.vmem [shape: f32[4,1,64], index: 2, kind: input, shape index: {}]   ;;  %s1851_s3 = inlined_call_operand.vmem [shape: f32[4,64,64], index: 3, kind: input, shape index: {}]   ;;  %s1852_s4 = inlined_call_operand.hbm [shape: f32[4,1,64], index: 4, kind: input, shape index: {}]   ;;  %s1853_s5 = inlined_call_operand.vmem [shape: f32[4,64,16], index: 5, kind: input, shape index: {}]   ;;  %s1854_s6 = inlined_call_operand.hbm [shape: f32[4,1,16], index: 6, kind: input, shape index: {}]   ;;  %s1855_s7 = inlined_call_operand.vmem [shape: f32[4,16,8], index: 7, kind: input, shape index: {}]   ;;  %s1856_s8 = inlined_call_operand.hbm [shape: f32[4,16,16], index: 8, kind: input, shape index: {}]   ;;  %s1857_s9 = inlined_call_operand.vmem [shape: f32[4,8,16], index: 9, kind: input, shape index: {}]   ;;  %s1858_s10 = inlined_call_operand.hbm [shape: f32[4,8,16], index: 10, kind: output, shape index: {0}]   ;;  %s1859_s11 = inlined_call_operand.vmem [shape: f32[8,1], index: 11, kind: output, shape index: {1}]   ;;  %s1860_s12 = inlined_call_operand.vmem [shape: f32[8,1], index: 12, kind: output, shape index: {2}]  }
   0x1   :  { %1870 = sst [smem:[#allocation24_spill]] %s1848_s0 }
   0x2   :  { %1871 = sst [smem:[#allocation25_spill]] %s1852_s4 }
   0x3   :  { %1872 = sst [smem:[#allocation26_spill]] %s1854_s6 }
   0x4   :  { %1873 = sst [smem:[#allocation27_spill]] %s1857_s9 }
   0x5   :  { %1874 = sst [smem:[#allocation28_spill]] %s1858_s10 }
   0x6   :  { %1875 = sst [smem:[#allocation29_spill]] %s1859_s11 }
   0x7   :  { %1876 = sst [smem:[#allocation30_spill]] %s1860_s12 }
   0x8   :  { %18 = vsyncpa [#allocation5], 0 }
   0x9   :  { %19 = vsyncpa [#allocation8], 0 }
   0xa   :  { %21 = vsyncpa [#allocation8 + $0x1], 0 }
   0xb   :  { %22 = vsyncpa [#allocation11], 0 }
   0xc   :  { %24 = vsyncpa [#allocation11 + $0x1], 0 }
   0xd   :  { %25 = vsyncpa [#allocation6], 0 }
   0xe   :  { %27 = vsyncpa [#allocation6 + $0x1], 0  ;;  %s1570_s21 = smov 0   ;;  %s1572_s22 = smov 0  }
   0xf   :  { %s1574_s23 = smov 0   ;;  %s1576_s24 = smov 0  }
  0x10   :  { %s1578_s25 = smov 0   ;;  %s1580_s26 = smov 0  }
  0x11 LB: > { %1877 = sst [smem:[#allocation17_spill]] %s1478_s21  ;;  %s42_s27 = sadd.s32 1, %s1494_s25  ;;  %s1498_s26 = sphi %s1580_s26, %s33_s26   ;;  %s1494_s25 = sphi %s1578_s25, %s1910_s25   ;;  %s1490_s24 = sphi %s1576_s24, %s1909_s24   ;;  %s1486_s23 = sphi %s1574_s23, %s1905_s23   ;;  %s1482_s22 = sphi %s1572_s22, %s1908_s22   ;;  %s1478_s21 = sphi %s1570_s21, %s1907_s21  }
  0x12   : > { %1878 = sst [smem:[#allocation18_spill]] %s1486_s23  ;;  %s156_s28 = sadd.s32 1, %s1486_s23 }
  0x13   : > { %1879 = sst [smem:[#allocation19_spill]] %s1498_s26  ;;  %p43_p0 = scmp.ge.s32.totalorder %s42_s27, 4 }
  0x14   : > { %p163_p1 = scmp.ne.s32.totalorder %s1486_s23, %s1482_s22  ;;  %p164_p2 = scmp.eq.s32.totalorder %s1498_s26, 0 }
  0x15   : > { %s1912_s27 = smov (%p43_p0, %s42_s27), 0  ;;  %p1227_p4 = scmp.lt.s32.totalorder %s1498_s26, 4 }
  0x16   : > { %1880 = sst [smem:[#allocation20_spill]] %s1912_s27  ;;  %p1610_p3 = por %p164_p2, %p163_p1 }
  0x17   : > { %s153_s30 = ssub.s32 %s1494_s25, %s1912_s27  ;;  %s439_s13 = sand.u32 1, %s1498_s26  }
  0x18   : > { %p154_p5 = scmp.eq.s32.totalorder %s153_s30, 0  ;;  %s1619_s14 = sand.u32 1, %s1486_s23  }
  0x19   : > { %s1882_s4 = sld [smem:[#allocation25_spill]]  ;;  %s442_s20 = scalar_lea.vmem [#allocation7], %s1619_s14 }
  0x1a   : > { %s1626_s18 = scalar_select %p154_p5, %s1486_s23, %s156_s28  }
  0x1b   : > { %s449_s27 = sshll.u32 %s442_s20, 4  ;;  %p1631_p6 = pnand %p1227_p4, %p1610_p3  ;;  %s450_s27 = int_to_ptr.vmem [resolvable:$true] %s449_s27 }
  0x1c   : > { %1883 = sst [smem:[#allocation21_spill]] %s1626_s18  ;;  %s1635_s15 = scalar_lea.sflag [#allocation8], %s439_s13 }
  0x1d   : > { %s1641_s28 = sadd.s32 4294967295, %s1498_s26   ;;  %s1156_s16 = sadd.s32 4294967294, %s1498_s26  }
  0x1e   : > { %p169_p7 = scmp.ne.s32.totalorder %s1482_s22, %s1478_s21  ;;  %p170_p8 = scmp.eq.s32.totalorder %s1641_s28, 0 }
  0x1f   : > { %s445_s17 = scalar_lea.hbm %s1882_s4, %s1494_s25  ;;  %p325_p9 = scmp.eq.s32.totalorder %s1641_s28, 3 }
  0x20   : > { %s447_s19 = sshll.u32 %s445_s17, 4  ;;  %p331_p10 = scmp.eq.s32.totalorder %s1156_s16, 3  ;;  %s448_s19 = int_to_ptr.hbm [resolvable:$true] %s447_s19 }
  0x21   : > { %1215 = dma.hbm_to_vmem [thread:$0]  (!%p1631_p6), %s448_s19, 16, %s450_s27, %s1635_s15  }
  0x22   : > { %p1157_p11 = scmp.ge.s32.totalorder %s1498_s26, 1  ;;  %p1651_p12 = por %p170_p8, %p169_p7 }
  0x23   : > { %p1658_p13 = por %p325_p9, %p163_p1  ;;  %p1662_p0 = por %p331_p10, %p169_p7 }
  0x24   : > { %p390_p2 = scmp.lt.s32.totalorder %s1498_s26, 5  ;;  %s1890_s0 = sld [smem:[#allocation24_spill]] }
  0x25   : > { %s1886_s27 = scalar_select %p1658_p13, 1, 0 }
  0x26   : > { %s1888_s13 = scalar_select %p1662_p0, 1, 0 }
  0x27   : > { %1887 = sst [smem:[#allocation22_spill]] %s1886_s27  ;;  %p1670_p3 = pnand %p1157_p11, %p390_p2 }
  0x28   : > { %1889 = sst [smem:[#allocation23_spill]] %s1888_s13  ;;  %s1500_s4 = smov [#allocation4]  }
  0x29   : > { %p1208_p1 = pneg %p1670_p3  ;;  %s406_s18 = sshll.u32 %s1500_s4, 4  ;;  %s407_s18 = int_to_ptr.vmem [resolvable:$true] %s406_s18 }
  0x2a   : > { %s404_s20 = sshll.u32 %s1890_s0, 4  ;;  %s1892_s6 = sld [smem:[#allocation26_spill]]  ;;  %s405_s20 = int_to_ptr.hbm [resolvable:$true] %s404_s20 }
  0x2b   : > { %p1209_p4 = pnand %p1208_p1, %p170_p8  ;;  %s467_s0 = scalar_lea.vmem [#allocation9], %s1619_s14 }
  0x2c   : > { %s474_s21 = sshll.u32 %s467_s0, 4  ;;  %s1160_s26 = sshll.u32 %s1619_s14, 4  ;;  %s475_s21 = int_to_ptr.vmem [resolvable:$true] %s474_s21 }
  0x2d   : > { %1211 = dma.hbm_to_vmem [thread:$0]  (!%p1209_p4), %s405_s20, 128, %s407_s18, [#allocation5]  }
  0x2e   : > { %s1191_s10 = sshll.u32 %s1494_s25, 4  ;;  %s493_s23 = scalar_lea.vmem [#allocation10], %s1160_s26 }
  0x2f   : > { %s498_s12 = scalar_lea.hbm %s1856_s8, %s1191_s10  ;;  %s501_s13 = sshll.u32 %s493_s23, 4  ;;  %s502_s13 = int_to_ptr.vmem [resolvable:$true] %s501_s13 }
  0x30   : > { %s470_s17 = scalar_lea.hbm %s1892_s6, %s1494_s25  ;;  %s499_s6 = sshll.u32 %s498_s12, 4  ;;  %s500_s6 = int_to_ptr.hbm [resolvable:$true] %s499_s6 }
  0x31   : > { %s472_s19 = sshll.u32 %s470_s17, 4  ;;  %s490_s17 = scalar_lea.sflag [#allocation11], %s1619_s14  ;;  %s473_s19 = int_to_ptr.hbm [resolvable:$true] %s472_s19 }
  0x32   : > { %1218 = dma.hbm_to_vmem [thread:$0]  (!%p1631_p6), %s473_s19, 16, %s475_s21, %s1635_s15  }
  0x33   : > { %s1501_s11 = smov 128   ;;  %s1502_s9 = smov 8  }
  0x34   : > { %1221 = dma.hbm_to_vmem [thread:$0]  (!%p1631_p6), %s500_s6, 256, %s502_s13, %s490_s17, %s1501_s11, %s1501_s11, %s1502_s9  }
  0x35   : > { %520 = sbr.rel (%p1670_p3) target bundleno = 873 (0x369), region = 60 }
  0x3a   : > { %1461 = dma.done.wait (%p170_p8), [#allocation5], 128  }
  0x3b   : > { %1463 = vsyncadd (%p170_p8), [#allocation5], 4294967168  ;;  %s527_s0 = sand.u32 1, %s1641_s28   ;;  %s1702_s10 = sand.u32 1, %s1482_s22  }
  0x3c   : > { %s528_s12 = scalar_lea.sflag [#allocation8], %s527_s0 }
  0x3d   : > { %1465 = dma.done.wait (%p1651_p12), %s528_s12, 32  }
  0x3e   : > { %1467 = vsyncadd (%p1651_p12), %s528_s12, 4294967264  ;;  %s1165_s6 = sshll.u32 %s1702_s10, 4  ;;  %s546_s11 = scalar_lea.sflag [#allocation11], %s1702_s10 }
  0x3f   : > { %s1712_s26 = scalar_lea.vmem [#allocation10], %s1165_s6 }
  0x40   : > { %1469 = dma.done.wait (%p1651_p12), %s546_s11, 256  }
  0x41   : > { %1471 = vsyncadd (%p1651_p12), %s546_s11, 4294967040  ;;  %s1166_s14 = sshll.u32 %s1702_s10, 3  ;;  %p634_p5 = scmp.lt.s32.totalorder %s1490_s24, 3 }
  0x42   : > { %s1893_s16 = sld [smem:[#allocation27_spill]]  ;;  %s1753_s27 = scalar_lea.vmem [#allocation12], %s1166_s14 }
  0x43   : > { %s1721_s18 = scalar_select %p634_p5, %s1490_s24, 3 }
  0x44   : > { %p1176_p6 = scmp.ne.s32.totalorder %s1490_s24, 0 }
  0x45   : > { %s1192_s30 = sshll.u32 %s1721_s18, 4  ;;  %s1193_s19 = sshll.u32 %s1721_s18, 6 }
  0x46   : > { %s638_s29 = scalar_lea.vmem %s1849_s1, %s1192_s30  ;;  %s1735_s13 = scalar_lea.vmem %s1851_s3, %s1193_s19 }
  0x47   : > { %s1740_s12 = scalar_lea.vmem %s1853_s5, %s1193_s19  ;;  %s1745_s15 = scalar_lea.vmem %s1855_s7, %s1192_s30 }
  0x48   : > { %s1175_s28 = sshll.u32 %s1721_s18, 3  ;;  %672 = sbr.rel (%p1176_p6) target bundleno = 80 (0x50), region = 80 }
  0x49   : > { %s1751_s21 = scalar_lea.vmem %s1893_s16, %s1175_s28 }
  0x4d   : > { %v673_v0 = vld [vmem:[#allocation4] sm:$0xff]  ;;  %vm674_vm0 = vcmask 130048   ;;  %vm676_vm1 = vcmask 7168   ;;  %v1503_v1 = vmov 0.0  }
  0x4e   : > { %675 = vst.msk [vmem:[#allocation2] sm:$0xff] %vm674_vm0, %v673_v0 }
  0x4f   : > { %677 = vst.msk [vmem:[#allocation3] sm:$0xff] %vm676_vm1, %v1503_v1 }
  0x50 PF: > { %v680_v2 = vld [vmem:[%s638_s29 + $0x8] sm:$0xff]  ;;  %v679_v3 = vld [vmem:[%s638_s29] sm:$0xff]  ;;  %vm708_vm2 = vcmask 130048   ;;  %v689_v5 = vld [vmem:[%s1735_s13 + $0x38] sm:$0xff]  ;;  %s1894_s30 = scalar_lea.vmem %s1850_s2, %s1721_s18  ;;  %vm738_vm4 = vcmask 523264   ;;  %s1895_s18 = scalar_lea.vmem [#allocation7], %s1702_s10 }
  0x51   : > { %726 = vmatpush.msra.mxu0 %v680_v2  ;;  %v688_v6 = vld [vmem:[%s1735_s13 + $0x30] sm:$0xff]  ;;  %750 = vmatpush.msra.mxu1 %v689_v5  ;;  %v687_v7 = vld [vmem:[%s1735_s13 + $0x28] sm:$0xff]  ;;  %v686_v8 = vld [vmem:[%s1735_s13 + $0x20] sm:$0xff]  ;;  %s1896_s29 = scalar_lea.vmem [#allocation9], %s1702_s10  ;;  %s1504_s19 = smov 120   ;;  %vm819_vm6 = vcmask 64512  }
  0x52   : > { %v685_v9 = vld [vmem:[%s1735_s13 + $0x18] sm:$0xff]  ;;  %v684_v10 = vld [vmem:[%s1735_s13 + $0x10] sm:$0xff]  ;;  %v683_v11 = vld [vmem:[%s1735_s13 + $0x8] sm:$0xff]  ;;  %vm869_vm7 = vcmask 7168   ;;  %p1183_p7 = scmp.ne.s32.totalorder %s1490_s24, 3 }
  0x53   : > { %727 = vmatpush.msra.mxu0 %v679_v3  ;;  %751 = vmatpush.msra.mxu1 %v688_v6  ;;  %v682_v12 = vld [vmem:[%s1735_s13] sm:$0xff]  ;;  %v698_v13 = vld [vmem:[%s1740_s12 + $0x38] sm:$0xff]  ;;  %v697_v14 = vld [vmem:[%s1740_s12 + $0x30] sm:$0xff]  ;;  %s1897_s4 = sld [smem:[#allocation29_spill]] (!%p1183_p7) }
  0x54   : > { %779 = vmatpush.msra.mxu2 %v698_v13  ;;  %v696_v15 = vld [vmem:[%s1740_s12 + $0x28] sm:$0xff]  ;;  %v695_v16 = vld [vmem:[%s1740_s12 + $0x20] sm:$0xff]  ;;  %v694_v17 = vld [vmem:[%s1740_s12 + $0x18] sm:$0xff]  ;;  %s1898_s17 = sld [smem:[#allocation30_spill]] (!%p1183_p7) }
  0x55   : > { %v1756_v4 = vld [vmem:[#allocation2] sm:$0xff]  ;;  %752 = vmatpush.msra.mxu1 %v687_v7  ;;  %v693_v23 = vld [vmem:[%s1740_s12 + $0x10] sm:$0xff]  ;;  %v692_v24 = vld [vmem:[%s1740_s12 + $0x8] sm:$0xff] }
  0x56   : > { %1177 = vmatmul.msk.f32.vlgmr.msra.gmra.mxu0 %vm708_vm2, %v1756_v4  ;;  %780 = vmatpush.msra.mxu2 %v697_v14  ;;  %v1283_v18 = vld [vmem:[%s1894_s30] ss:$0 sm:$0xff]  ;;  %v701_v26 = vld [vmem:[%s1745_s15 + $0x8] sm:$0xff] }
  0x57   : > { %753 = vmatpush.msra.mxu1 %v686_v8  ;;  %v691_v25 = vld [vmem:[%s1740_s12] sm:$0xff]  ;;  %805 = vmatpush.msra.mxu3 %v701_v26  ;;  %v864_v46 = vld [vmem:[#allocation3] sm:$0xff] }
  0x58   : > { %781 = vmatpush.msra.mxu2 %v696_v15  ;;  %v700_v27 = vld [vmem:[%s1745_s15] sm:$0xff] }
  0x59   : > { %754 = vmatpush.msra.mxu1 %v685_v9  ;;  %806 = vmatpush.msra.mxu3 %v700_v27  ;;  %v1284_v28 = vld [vmem:[%s1895_s18] ss:$0 sm:$0xff]  ;;  %v703_v36 = vld [vmem:[%s1712_s26 + $0x8] sm:$0xff] }
  0x5a   : > { %782 = vmatpush.msra.mxu2 %v695_v16  ;;  %1180 = vmatmul.msk.f32.vlgmr.msra.gmra.mxu3 %vm708_vm2, %v1756_v4  ;;  %v1285_v33 = vld [vmem:[%s1896_s29] ss:$0 sm:$0xff] }
  0x5b   : > { %755 = vmatpush.msra.mxu1 %v684_v10  ;;  %v702_v37 = vld [vmem:[%s1712_s26] sm:$0xff]  ;;  %857 = vmatpush.msrb.mxu3 %v703_v36 }
  0x5c   : > { %783 = vmatpush.msra.mxu2 %v694_v17  ;;  %v704_v38 = vld [vmem:[%s1751_s21] sm:$0xff] }
  0x5d   : > { %756 = vmatpush.msra.mxu1 %v683_v11  ;;  %838 = vmatpush.msrb.mxu0 %v704_v38 }
  0x5e   : > { %784 = vmatpush.msra.mxu2 %v693_v23  ;;  %858 = vmatpush.msrb.mxu3 %v702_v37 }
  0x5f   : > { %757 = vmatpush.msra.mxu1 %v682_v12 }
  0x60   : > { %785 = vmatpush.msra.mxu2 %v692_v24 }
  0x62   : > { %786 = vmatpush.msra.mxu2 %v691_v25  ;;  %1182 = vmatmul.msk.f32.vlgmr.msrb.gmra.mxu3 %vm708_vm2, %v1756_v4 }
  0xd3   : > { %v729_v19 = vpop.f32.mrf.mxu0 }
  0xd4   : > { %v730_v20 = vadd.f32 %v1283_v18, %v729_v19 }
  0xd6   : > { %v733_v21 = vmul.f32 0.2, %v730_v20  ;;  %vm732_vm3 = vcmp.gt.f32.partialorder %v730_v20, 0.0 }
  0xd8   : > { %v734_v22 = vsel %vm732_vm3, %v730_v20, %v733_v21 }
  0xd9   : > { %1178 = vmatmul.msk.f32.vlgmr.msra.gmra.mxu1 %vm738_vm4, %v734_v22 }
  0xdd   : > { %v808_v42 = vpop.f32.mrf.mxu3 }
  0xe5   : > { %v860_v49 = vpop.f32.mrf.mxu3 }
 0x156   : > { %v759_v29 = vpop.f32.mrf.mxu1 }
 0x157   : > { %v760_v30 = vadd.f32 %v1284_v28, %v759_v29 }
 0x159   : > { %v763_v31 = vmul.f32 0.2, %v760_v30  ;;  %vm762_vm5 = vcmp.gt.f32.partialorder %v760_v30, 0.0 }
 0x15b   : > { %v764_v32 = vsel %vm762_vm5, %v760_v30, %v763_v31 }
 0x15c   : > { %1179 = vmatmul.msk.f32.vlgmr.msra.gmra.mxu2 %vm738_vm4, %v764_v32 }
 0x1df   : > { %v788_v34 = vpop.f32.mrf.mxu2 }
 0x1e0   : > { %v789_v35 = vadd.f32 %v1285_v33, %v788_v34 }
 0x1e2   : > { %815 = vrot.lane.b32.xlu0 %v789_v35, %s1504_s19  ;;  %v865_v39 = vsel %vm819_vm6, %v789_v35, 0.0  ;;  %v811_v40 = vmul.f32 1.442695, %v789_v35 }
 0x1e4   : > { %1286 = vpow2.f32 %v811_v40 }
 0x1ea   : > { %v1287_v41 = vpop.eup %1286 }
 0x1eb   : > { %v813_v43 = vmul.f32 %v1287_v41, %v808_v42 }
 0x20c   : > { %866 = vadd.xlane.f32.xlu0 %v865_v39 }
 0x254   : > { %v816_v44 = vpop.permute.xlu0 %815 }
 0x255   : > { %v818_v45 = vadd.f32 %v816_v44, %v813_v43 }
 0x257   : > { %1181 = vmatmul.msk.f32.vlgmr.msrb.gmra.mxu0 %vm819_vm6, %v818_v45 }
 0x27f   : > { %v867_v47 = vpop.xlane.xlu0 %866 }
 0x280   : > { %v868_v48 = vadd.f32 %v867_v47, %v864_v46 }
 0x282   : > { %870 = vst.msk [vmem:[#allocation3] sm:$0xff] %vm869_vm7, %v868_v48 }
 0x2d4   : > { %v840_v50 = vpop.f32.mrf.mxu0  ;;  %875 = sbr.rel (%p1183_p7) target bundleno = 853 (0x355), region = 84 }
 0x2d5   : > { %v861_v51 = vadd.f32 %v860_v49, %v840_v50 }
 0x2d7   : > { %863 = vst.msk [vmem:[#allocation2] sm:$0xff] %vm708_vm2, %v861_v51 }
 0x2d8   : > { %871 = vst.msk [vmem:[%s1753_s27] sm:$0xff] %vm708_vm2, %v861_v51 }
 0x2d9   : > { %v876_v52 = vld [vmem:[#allocation3] sm:$0xff]  ;;  %v878_v53 = vmul.f32 %v861_v51, %v861_v51 }
 0x2da   : > { %877 = vst.msk [vmem:[%s1897_s4] sm:$0xff] %vm869_vm7, %v876_v52 }
 0x2db   : > { %v879_v54 = vsel %vm708_vm2, %v878_v53, 0.0 }
 0x2dc   : > { %880 = vadd.xlane.f32.xlu0 %v879_v54 }
 0x34f   : > { %v881_v55 = vpop.xlane.xlu0 %880 }
 0x350   : > { %v882_v56 = vmul.f32 -0.5, %v881_v55 }
 0x352   : > { %v1184_v57 = vadd.f32 -14.703016, %v882_v56 }
 0x354   : > { %884 = vst.msk [vmem:[%s1898_s17] sm:$0xff] %vm869_vm7, %v1184_v57 }
 0x355 PF: > { %s1186_s12 = sshll.u32 %s1490_s24, 3  ;;  %s1900_s15 = sld [smem:[#allocation28_spill]] }
 0x356   : > { %s907_s20 = sshll.u32 %s1753_s27, 4  ;;  %s886_s9 = scalar_lea.sflag [#allocation6], %s1702_s10  ;;  %s908_s20 = int_to_ptr.vmem [resolvable:$true] %s907_s20 }
 0x35b   : > { %s905_s28 = scalar_lea.hbm %s1900_s15, %s1186_s12  ;;  %s1428_s24 = scalar_lea.hbm %s1900_s15, 32 }
 0x35c   : > { %s909_s16 = sshll.u32 %s905_s28, 4  ;;  %s910_s16 = int_to_ptr.hbm [resolvable:$true] %s909_s16 }
 0x35d   : > { %s1422_s14 = sshra.s32 %s910_s16, 4  ;;  %s1423_s14 = int_to_ptr.hbm [resolvable:$true] %s1422_s14 }
 0x35e   : > { %s1424_s30 = scalar_lea.hbm %s1423_s14, 8  ;;  %p1429_p11 = scmp.lt.s32.totalorder %s1423_s14, %s1900_s15 }
 0x35f   : > { %p1425_p8 = scmp.ne.s32.totalorder %s1423_s14, %s1424_s30  ;;  %p1430_p12 = scmp.lt.s32.totalorder %s1428_s24, %s1424_s30 }
 0x361   : > { %p1426_p9 = pnand %p1425_p8, %p1658_p13  ;;  %p1431_p2 = por %p1430_p12, %p1429_p11 }
 0x363   : > { %p1427_p10 = pneg %p1426_p9 }
 0x365   : > { %p1432_p3 = pnand %p1431_p2, %p1427_p10 }
 0x367   : > { %1435 = shalt.err (!%p1432_p3)
}
 0x368   : > { %1206 = dma.vmem_to_hbm [thread:$0]  (%p1658_p13), %s908_s20, 128, %s910_s16, %s886_s9  }
 0x369 PF: > { %s1901_s10 = sld [smem:[#allocation19_spill]] }
 0x36a   : > { %s1902_s27 = sld [smem:[#allocation17_spill]] }
 0x36f   : > { %p1229_p1 = scmp.ge.s32.totalorder %s1901_s10, 2 }
 0x370   : > { %s941_s4 = sand.u32 1, %s1902_s27  }
 0x371   : > { %p1223_p4 = pnand %p1229_p1, %p1662_p0  ;;  %s942_s23 = scalar_lea.sflag [#allocation6], %s941_s4 }
 0x373   : > { %p1224_p5 = pneg %p1223_p4 }
 0x375   : > { %1473 = dma.done.wait (%p1224_p5), %s942_s23, 128  }
 0x376   : > { %1475 = vsyncadd (%p1224_p5), %s942_s23, 4294967168  ;;  %s33_s26 = sadd.s32 1, %s1901_s10   ;;  %s1904_s13 = sld [smem:[#allocation18_spill]] }
 0x377   : > { %p30_p6 = scmp.ge.s32.totalorder %s33_s26, 6   ;;  %s1905_s23 = sld [smem:[#allocation21_spill]] }
 0x378   : > { %s1906_s17 = sld [smem:[#allocation20_spill]]  ;;  %s1907_s21 = smov %s1482_s22 }
 0x379   : > { %s1909_s24 = smov %s1494_s25 }
 0x37a   :  { %32 = sbr.rel (!%p30_p6) target bundleno = 17 (0x11), region = 185 }
 0x37c   : > { %s1908_s22 = smov %s1904_s13 }
 0x37e   : > { %s1910_s25 = smov %s1906_s17 }
 0x37f   :  { %948 = vsyncpa [#allocation5], 1 }
 0x380   :  { %950 = vsyncpa [#allocation5 + $0x1], 1 }
 0x381   :  { %951 = vsyncpa [#allocation8], 1 }
 0x382   :  { %953 = vsyncpa [#allocation8 + $0x1], 1 }
 0x383   :  { %954 = vsyncpa [#allocation11], 1 }
 0x384   :  { %956 = vsyncpa [#allocation11 + $0x1], 1 }
 0x385   :  { %957 = vsyncpa [#allocation6], 1 }
 0x386   :  { %959 = vsyncpa [#allocation6 + $0x1], 1 }

</bundles_post_ra>
